<compile_context>
chip_gen: v7x
topology: tpu7x:2x2x1
jax: 0.10.0
libtpu: 0.0.40
codegen_flags: <defaults>
</compile_context>

<pallas_src>
import functools

import jax
import jax.numpy as jnp
from jax.experimental import pallas as pl
from jax.experimental.pallas import tpu as pltpu

EPS = 1e-5


# ---------------------------------------------------------------------------
# Pallas kernels
#   mode == "none":  y = maybe_relu(a @ W + b)                      (conv1)
#   mode == "add":   y = relu(relu(a @ W + b) + r)                  (conv2, identity skip)
#   mode == "conv":  y = relu(relu(a @ W + b) + (sa @ Ws + bs))     (conv2, fused 1x1 skip)
# ---------------------------------------------------------------------------
def _make_kernel(apply_relu, mode, multi_k):
    def _epilogue(acc, bias, extra):
        y = acc + bias
        if apply_relu:
            y = jnp.maximum(y, 0.0)
        if mode != "none":
            # ReLU(bn2(conv2)) FIRST, then add shortcut, then final ReLU
            # (matches the given PyTorch module).
            y = jnp.maximum(y + extra, 0.0)
        return y

    if not multi_k:
        # Whole contraction in one tile: no accumulator scratch, no pl.when.
        if mode == "none":
            def kernel(a_ref, w_ref, b_ref, o_ref):
                acc = jnp.dot(a_ref[...], w_ref[...],
                              preferred_element_type=jnp.float32)
                o_ref[...] = _epilogue(acc, b_ref[...], None).astype(o_ref.dtype)
        elif mode == "add":
            def kernel(a_ref, w_ref, b_ref, r_ref, o_ref):
                acc = jnp.dot(a_ref[...], w_ref[...],
                              preferred_element_type=jnp.float32)
                o_ref[...] = _epilogue(
                    acc, b_ref[...], r_ref[...].astype(jnp.float32)
                ).astype(o_ref.dtype)
        else:  # "conv"
            def kernel(a_ref, w_ref, b_ref, sa_ref, sw_ref, sb_ref, o_ref):
                acc = jnp.dot(a_ref[...], w_ref[...],
                              preferred_element_type=jnp.float32)
                sc = jnp.dot(sa_ref[...], sw_ref[...],
                             preferred_element_type=jnp.float32) + sb_ref[...]
                o_ref[...] = _epilogue(acc, b_ref[...], sc).astype(o_ref.dtype)
        return kernel

    # Multi-K path: f32 accumulator scratch, init/finalize via pl.when.
    def _step(a_ref, w_ref, acc_ref):
        @pl.when(pl.program_id(2) == 0)
        def _():
            acc_ref[...] = jnp.zeros_like(acc_ref)
        acc_ref[...] += jnp.dot(a_ref[...], w_ref[...],
                                preferred_element_type=jnp.float32)

    def _is_last():
        return pl.program_id(2) == pl.num_programs(2) - 1

    if mode == "none":
        def kernel(a_ref, w_ref, b_ref, o_ref, acc_ref):
            _step(a_ref, w_ref, acc_ref)

            @pl.when(_is_last())
            def _():
                o_ref[...] = _epilogue(acc_ref[...], b_ref[...],
                                       None).astype(o_ref.dtype)
    elif mode == "add":
        def kernel(a_ref, w_ref, b_ref, r_ref, o_ref, acc_ref):
            _step(a_ref, w_ref, acc_ref)

            @pl.when(_is_last())
            def _():
                o_ref[...] = _epilogue(
                    acc_ref[...], b_ref[...], r_ref[...].astype(jnp.float32)
                ).astype(o_ref.dtype)
    else:  # "conv"
        def kernel(a_ref, w_ref, b_ref, sa_ref, sw_ref, sb_ref, o_ref, acc_ref):
            _step(a_ref, w_ref, acc_ref)

            @pl.when(_is_last())
            def _():
                sc = jnp.dot(sa_ref[...], sw_ref[...],
                             preferred_element_type=jnp.float32) + sb_ref[...]
                o_ref[...] = _epilogue(acc_ref[...], b_ref[...],
                                       sc).astype(o_ref.dtype)
    return kernel


# ---------------------------------------------------------------------------
# Tiling / footprint helpers
# ---------------------------------------------------------------------------
def _round_up(x, m):
    return -(-x // m) * m


def _pick_tile(dim, candidates):
    for c in candidates:
        if c <= dim and dim % c == 0:
            return c
    return dim  # fall back to the full (untiled) dimension


def _buf_bytes(rows, cols, itemsize):
    # Conservative VMEM footprint of one (rows, cols) buffer under (8,128) tiling.
    return _round_up(max(rows, 1), 8) * _round_up(max(cols, 1), 128) * itemsize


def _vmem_footprint(tm, tn, tk, mode, cin_sc, multi_k, out_itemsize):
    b = 2 * _buf_bytes(tm, tk, 2)        # im2col activations (bf16, double buffered)
    b += 2 * _buf_bytes(tk, tn, 2)       # BN-folded weights (bf16)
    b += 2 * _buf_bytes(1, tn, 4)        # bias (f32)
    if mode == "add":
        b += 2 * _buf_bytes(tm, tn, 2)   # residual (bf16)
    elif mode == "conv":
        b += 2 * (_buf_bytes(tm, cin_sc, 2) + _buf_bytes(cin_sc, tn, 2)
                  + _buf_bytes(1, tn, 4))
    b += 2 * _buf_bytes(tm, tn, out_itemsize)   # output
    if multi_k:
        b += _buf_bytes(tm, tn, 4)              # accumulator scratch
    return b


# ---------------------------------------------------------------------------
# Fused conv-as-matmul wrapper
# ---------------------------------------------------------------------------
def fused_conv_matmul(a, w_mat, bias, *, residual=None, shortcut=None,
                      apply_relu=True, out_dtype=jnp.float32):
    """Returns an (M, Cp) array, Cp = round_up(Cout, 128); caller slices channels."""
    assert residual is None or shortcut is None
    M, K = a.shape
    Cout = w_mat.shape[1]
    Cp = _round_up(Cout, 128)     # lane-dense output channels

    mode = "add" if residual is not None else ("conv" if shortcut is not None
                                               else "none")

    # Rare fallback only: pad M up to a multiple of 128 (no-op for shapes here).
    Mp = _round_up(M, 128)
    if Mp != M:
        a = jnp.pad(a, ((0, Mp - M), (0, 0)))
        if residual is not None:
            residual = jnp.pad(residual, ((0, Mp - M), (0, 0)))
        if shortcut is not None:
            sa, sw, sb = shortcut
            shortcut = (jnp.pad(sa, ((0, Mp - M), (0, 0))), sw, sb)

    # bf16 MXU feed, f32 accumulate/epilogue; zero-pad Cout to Cp.
    a = a.astype(jnp.bfloat16)
    w_mat = jnp.pad(w_mat, ((0, 0), (0, Cp - Cout))).astype(jnp.bfloat16)
    bias = jnp.pad(bias.reshape(1, Cout),
                   ((0, 0), (0, Cp - Cout))).astype(jnp.float32)

    cin_sc = 0
    if mode == "add":
        residual = jnp.pad(residual,
                           ((0, 0), (0, Cp - Cout))).astype(jnp.bfloat16)
    elif mode == "conv":
        sa, sw, sb = shortcut
        cin_sc = sa.shape[1]
        sa = sa.astype(jnp.bfloat16)
        sw = jnp.pad(sw, ((0, 0), (0, Cp - Cout))).astype(jnp.bfloat16)
        sb = jnp.pad(sb.reshape(1, Cout),
                     ((0, 0), (0, Cp - Cout))).astype(jnp.float32)

    # ---- tile selection (VMEM-budget aware, prefer a single K step) ----------
    tm = _pick_tile(Mp, (1024, 512, 256, 128))
    tn = _pick_tile(Cp, (512, 256, 128))
    tk = K if K <= 2048 else _pick_tile(K, (1024, 512, 384, 256, 128))
    multi_k = tk < K
    out_itemsize = jnp.dtype(out_dtype).itemsize

    budget = 32 * 1024 * 1024
    while (_vmem_footprint(tm, tn, tk, mode, cin_sc, multi_k, out_itemsize) > budget
           and (tm > 128 or tn > 128)):
        if tm > 128:
            tm //= 2
        else:
            tn //= 2

    # v7x: two TensorCores are fed via the "parallel" grid axes; make sure the
    # parallel extent is >= 2 when the problem allows it.
    while (Mp // tm) * (Cp // tn) < 2 and tm >= 256:
        tm //= 2

    footprint = _vmem_footprint(tm, tn, tk, mode, cin_sc, multi_k, out_itemsize)
    vmem_limit = int(min(max(footprint + 8 * 1024 * 1024, 16 * 1024 * 1024),
                         48 * 1024 * 1024))

    # ---- specs ----------------------------------------------------------------
    if multi_k:
        grid = (Mp // tm, Cp // tn, K // tk)
        a_spec = pl.BlockSpec((tm, tk), lambda i, j, k: (i, k))
        w_spec = pl.BlockSpec((tk, tn), lambda i, j, k: (k, j))
        b_spec = pl.BlockSpec((1, tn), lambda i, j, k: (0, j))
        mn_spec = pl.BlockSpec((tm, tn), lambda i, j, k: (i, j))
        sa_spec = pl.BlockSpec((tm, cin_sc), lambda i, j, k: (i, 0))
        sw_spec = pl.BlockSpec((cin_sc, tn), lambda i, j, k: (0, j))
        scratch = [pltpu.VMEM((tm, tn), jnp.float32)]
        dims = ("parallel", "parallel", "arbitrary")
    else:
        grid = (Mp // tm, Cp // tn)
        a_spec = pl.BlockSpec((tm, tk), lambda i, j: (i, 0))
        w_spec = pl.BlockSpec((tk, tn), lambda i, j: (0, j))
        b_spec = pl.BlockSpec((1, tn), lambda i, j: (0, j))
        mn_spec = pl.BlockSpec((tm, tn), lambda i, j: (i, j))
        sa_spec = pl.BlockSpec((tm, cin_sc), lambda i, j: (i, 0))
        sw_spec = pl.BlockSpec((cin_sc, tn), lambda i, j: (0, j))
        scratch = []
        dims = ("parallel", "parallel")

    args = [a, w_mat, bias]
    in_specs = [a_spec, w_spec, b_spec]
    if mode == "add":
        args.append(residual)
        in_specs.append(mn_spec)
    elif mode == "conv":
        args += [sa, sw, sb]
        in_specs += [sa_spec, sw_spec, b_spec]

    flops = 2 * Mp * Cp * K
    bytes_acc = Mp * K * 2 + K * Cp * 2 + Cp * 4 + Mp * Cp * out_itemsize
    if mode == "add":
        bytes_acc += Mp * Cp * 2
    elif mode == "conv":
        flops += 2 * Mp * Cp * cin_sc
        bytes_acc += Mp * cin_sc * 2 + cin_sc * Cp * 2 + Cp * 4

    out = pl.pallas_call(
        _make_kernel(apply_relu, mode, multi_k),
        out_shape=jax.ShapeDtypeStruct((Mp, Cp), out_dtype),
        grid_spec=pltpu.PrefetchScalarGridSpec(
            num_scalar_prefetch=0,
            grid=grid,
            in_specs=in_specs,
            out_specs=mn_spec,
            scratch_shapes=scratch,
        ),
        compiler_params=pltpu.CompilerParams(
            dimension_semantics=dims,
            vmem_limit_bytes=vmem_limit,
        ),
        cost_estimate=pl.CostEstimate(flops=int(flops), transcendentals=0,
                                      bytes_accessed=int(bytes_acc)),
    )(*args)
    return out if Mp == M else out[:M]


# ---------------------------------------------------------------------------
# Glue: im2col, weight reshape, BN folding (plain JAX)
# ---------------------------------------------------------------------------
def im2col(x_nhwc, kh, kw, stride, pad):
    x = x_nhwc
    if pad:
        x = jnp.pad(x, ((0, 0), (pad, pad), (pad, pad), (0, 0)))
    N, Hp, Wp, C = x.shape
    Ho = (Hp - kh) // stride + 1
    Wo = (Wp - kw) // stride + 1
    patches = []
    for i in range(kh):
        for j in range(kw):
            patches.append(
                x[:, i:i + (Ho - 1) * stride + 1:stride,
                  j:j + (Wo - 1) * stride + 1:stride, :])
    cols = jnp.concatenate(patches, axis=-1)            # (N, Ho, Wo, kh*kw*C)
    return cols.reshape(N * Ho * Wo, kh * kw * C), (N, Ho, Wo)


def oihw_to_mat(w_oihw):
    # (Cout, Cin, KH, KW) -> (KH*KW*Cin, Cout), matching im2col tap order.
    return jnp.transpose(w_oihw, (2, 3, 1, 0)).reshape(-1, w_oihw.shape[0])


def fold_bn_into_weight(w_mat, conv_bias, gamma, beta, mean, var):
    # (a @ W) * s == a @ (W * s): fold the BN scale into the weights so the
    # kernel epilogue is a single bias add.
    scale = gamma / jnp.sqrt(var + EPS)
    return w_mat * scale[None, :], beta + (conv_bias - mean) * scale


# ---------------------------------------------------------------------------
# ResBlock forward (Pallas path)
# ---------------------------------------------------------------------------
def resblock_forward(x_nchw, params, downsample):
    x = jnp.transpose(x_nchw, (0, 2, 3, 1))             # NCHW -> NHWC
    cin = x.shape[-1]
    cout = params["w1"].shape[0]
    stride1 = 2 if downsample else 1

    # conv1 + bn1 + relu   (bf16 intermediate: it feeds a bf16 matmul anyway)
    a1, (N, Ho, Wo) = im2col(x, 3, 3, stride1, 1)
    w1, b1 = fold_bn_into_weight(oihw_to_mat(params["w1"]), params["b1"],
                                 *params["bn1"])
    y1 = fused_conv_matmul(a1, w1, b1, apply_relu=True, out_dtype=jnp.bfloat16)
    # Slice channel padding BEFORE the next im2col so conv2's contraction
    # stays 9*cout (not 9*Cp).
    y1 = y1[:, :cout].reshape(N, Ho, Wo, cout)

    # conv2 + bn2 + relu + shortcut add + final relu — single fused kernel.
    a2, _ = im2col(y1, 3, 3, 1, 1)
    w2, b2 = fold_bn_into_weight(oihw_to_mat(params["w2"]), params["b2"],
                                 *params["bn2"])

    if downsample:
        # Fuse the 1x1/stride-2 shortcut conv + BN into conv2's epilogue.
        ws, bs = fold_bn_into_weight(oihw_to_mat(params["ws"]), params["bs"],
                                     *params["bns"])
        sa = x[:, ::2, ::2, :].reshape(-1, cin)          # stride-2 taps of x
        y2 = fused_conv_matmul(a2, w2, b2, shortcut=(sa, ws, bs),
                               apply_relu=True, out_dtype=jnp.float32)
    else:
        assert cin == cout, "identity shortcut requires Cin == Cout"
        residual = x.reshape(-1, cin)                    # identity shortcut
        y2 = fused_conv_matmul(a2, w2, b2, residual=residual,
                               apply_relu=True, out_dtype=jnp.float32)

    out = y2[:, :cout].reshape(N, Ho, Wo, cout)
    return jnp.transpose(out, (0, 3, 1, 2))              # NHWC -> NCHW


# ---------------------------------------------------------------------------
# Pure-JAX reference (for correctness check) — mirrors the PyTorch module.
# ---------------------------------------------------------------------------
def resblock_ref(x_nchw, params, downsample):
    x = jnp.transpose(x_nchw, (0, 2, 3, 1))

    def conv(x, w_oihw, b, stride, pad):
        w = jnp.transpose(w_oihw, (2, 3, 1, 0))
        y = jax.lax.conv_general_dilated(
            x, w, (stride, stride), ((pad, pad), (pad, pad)),
            dimension_numbers=("NHWC", "HWIO", "NHWC"))
        return y + b

    def bn(y, gamma, beta, mean, var):
        return (y - mean) / jnp.sqrt(var + EPS) * gamma + beta

    stride1 = 2 if downsample else 1
    h = jax.nn.relu(bn(conv(x, params["w1"], params["b1"], stride1, 1), *params["bn1"]))
    h = jax.nn.relu(bn(conv(h, params["w2"], params["b2"], 1, 1), *params["bn2"]))
    if downsample:
        sc = bn(conv(x, params["ws"], params["bs"], 2, 0), *params["bns"])
    else:
        sc = x
    out = jax.nn.relu(h + sc)
    return jnp.transpose(out, (0, 3, 1, 2))


# ---------------------------------------------------------------------------
# Deterministic parameter init
# ---------------------------------------------------------------------------
def init_conv(key, cout, cin, kh, kw):
    k1, k2 = jax.random.split(key)
    bound = 1.0 / float(cin * kh * kw) ** 0.5
    w = jax.random.uniform(k1, (cout, cin, kh, kw), jnp.float32, -bound, bound)
    b = jax.random.uniform(k2, (cout,), jnp.float32, -bound, bound)
    return w, b


def init_bn(key, c):
    k1, k2, k3, k4 = jax.random.split(key, 4)
    gamma = 1.0 + 0.1 * jax.random.normal(k1, (c,), jnp.float32)
    beta = 0.1 * jax.random.normal(k2, (c,), jnp.float32)
    mean = 0.1 * jax.random.normal(k3, (c,), jnp.float32)
    var = 1.0 + 0.1 * jnp.abs(jax.random.normal(k4, (c,), jnp.float32))
    return gamma, beta, mean, var


def make_params(key, cin, cout, downsample):
    keys = jax.random.split(key, 6)
    w1, b1 = init_conv(keys[0], cout, cin, 3, 3)
    w2, b2 = init_conv(keys[1], cout, cout, 3, 3)
    params = {
        "w1": w1, "b1": b1, "bn1": init_bn(keys[2], cout),
        "w2": w2, "b2": b2, "bn2": init_bn(keys[3], cout),
    }
    if downsample:
        ws, bs = init_conv(keys[4], cout, cin, 1, 1)
        params.update({"ws": ws, "bs": bs, "bns": init_bn(keys[5], cout)})
    return params


# ---------------------------------------------------------------------------
if __name__ == "__main__":
    key = jax.random.PRNGKey(0)
    kx, kp1, kp2 = jax.random.split(key, 3)

    x = jax.random.normal(kx, (2, 4, 16, 16), jnp.float32)

    # Case 1: downsample=True, in=4 -> out=8 channels, spatial 16 -> 8
    # (exercises the fused 1x1-shortcut "conv" epilogue, single-K kernels)
    params_ds = make_params(kp1, 4, 8, downsample=True)
    out_ds = jax.block_until_ready(
        jax.jit(functools.partial(resblock_forward, downsample=True))(x, params_ds))
    ref_ds = resblock_ref(x, params_ds, downsample=True)
    assert out_ds.shape == (2, 8, 8, 8), out_ds.shape
    # bf16 MXU feed / bf16 residual stream (f32 accumulation) -> loosened tol.
    assert jnp.allclose(out_ds, ref_ds, atol=3e-2, rtol=2e-2), float(
        jnp.max(jnp.abs(out_ds - ref_ds)))

    # Case 2: downsample=False, in=out=4 channels, identity (add-mode) shortcut
    params_id = make_params(kp2, 4, 4, downsample=False)
    out_id = jax.block_until_ready(
        jax.jit(functools.partial(resblock_forward, downsample=False))(x, params_id))
    ref_id = resblock_ref(x, params_id, downsample=False)
    assert out_id.shape == (2, 4, 16, 16), out_id.shape
    assert jnp.allclose(out_id, ref_id, atol=3e-2, rtol=2e-2), float(
        jnp.max(jnp.abs(out_id - ref_id)))

    print("KERNEL_OK")
</pallas_src>

<mosaic_0001>
module attributes {stable_mosaic.version = 11 : i64} {
  func.func @kernel(%arg0: i32, %arg1: i32, %arg2: memref<128x36xbf16, #tpu.memory_space<vmem>>, %arg3: memref<36x128xbf16, #tpu.memory_space<vmem>>, %arg4: memref<1x128xf32, #tpu.memory_space<vmem>>, %arg5: memref<128x128xbf16, #tpu.memory_space<vmem>>) attributes {dimension_semantics = [#tpu.dimension_semantics<parallel>, #tpu.dimension_semantics<parallel>], iteration_bounds = array<i64: 1, 1>, scalar_prefetch = 0 : i64, scratch_operands = 0 : i64, tpu.core_type = #tpu.core_type<tc>, window_params = [{transform_indices = @transform_0, window_bounds = array<i64: 128, 36>}, {transform_indices = @transform_1, window_bounds = array<i64: 36, 128>}, {transform_indices = @transform_2, window_bounds = array<i64: 1, 128>}, {transform_indices = @transform_3, window_bounds = array<i64: 128, 128>}]} {
    %c0 = arith.constant 0 : index
    %c0_0 = arith.constant 0 : index
    %0 = vector.load %arg2[%c0, %c0_0] : memref<128x36xbf16, #tpu.memory_space<vmem>>, vector<128x36xbf16>
    %c0_1 = arith.constant 0 : index
    %c0_2 = arith.constant 0 : index
    %1 = vector.load %arg3[%c0_1, %c0_2] : memref<36x128xbf16, #tpu.memory_space<vmem>>, vector<36x128xbf16>
    %cst = arith.constant dense<0.000000e+00> : vector<128x128xf32>
    %2 = tpu.matmul %0, %1, %cst {dimension_numbers = #tpu.dot_dimension_numbers<[1], [0], [0], [1], [0, 0, 1, 1], [], []>} : vector<128x36xbf16>, vector<36x128xbf16>, vector<128x128xf32> -> vector<128x128xf32>
    %c0_3 = arith.constant 0 : index
    %c0_4 = arith.constant 0 : index
    %3 = vector.load %arg4[%c0_3, %c0_4] : memref<1x128xf32, #tpu.memory_space<vmem>>, vector<1x128xf32>
    %4 = vector.broadcast %3 : vector<1x128xf32> to vector<128x128xf32>
    %5 = arith.addf %2, %4 : vector<128x128xf32>
    %cst_5 = arith.constant 0.000000e+00 : f32
    %6 = vector.broadcast %cst_5 : f32 to vector<128x128xf32>
    %7 = arith.maximumf %5, %6 : vector<128x128xf32>
    %8 = arith.truncf %7 : vector<128x128xf32> to vector<128x128xbf16>
    %c0_6 = arith.constant 0 : index
    %c0_7 = arith.constant 0 : index
    %9 = vector.load %arg5[%c0_6, %c0_7] : memref<128x128xbf16, #tpu.memory_space<vmem>>, vector<128x128xbf16>
    tpu.vector_store %arg5[%c0_6, %c0_7], %8 {strides = array<i32>} : memref<128x128xbf16, #tpu.memory_space<vmem>>, vector<128x128xbf16>,
    return
  }
  func.func @transform_0(%arg0: i32, %arg1: i32) -> (i32, i32) {
    %c0_i32 = arith.constant 0 : i32
    %c0_i32_0 = arith.constant 0 : i32
    return %arg0, %c0_i32 : i32, i32
  }
  func.func @transform_1(%arg0: i32, %arg1: i32) -> (i32, i32) {
    %c0_i32 = arith.constant 0 : i32
    %c0_i32_0 = arith.constant 0 : i32
    return %c0_i32, %arg1 : i32, i32
  }
  func.func @transform_2(%arg0: i32, %arg1: i32) -> (i32, i32) {
    %c0_i32 = arith.constant 0 : i32
    %c0_i32_0 = arith.constant 0 : i32
    return %c0_i32, %arg1 : i32, i32
  }
  func.func @transform_3(%arg0: i32, %arg1: i32) -> (i32, i32) {
    %c0_i32 = arith.constant 0 : i32
    return %arg0, %arg1 : i32, i32
  }
}

module attributes {stable_mosaic.version = 11 : i64} {
  func.func @kernel(%arg0: i32, %arg1: i32, %arg2: memref<128x72xbf16, #tpu.memory_space<vmem>>, %arg3: memref<72x128xbf16, #tpu.memory_space<vmem>>, %arg4: memref<1x128xf32, #tpu.memory_space<vmem>>, %arg5: memref<128x4xbf16, #tpu.memory_space<vmem>>, %arg6: memref<4x128xbf16, #tpu.memory_space<vmem>>, %arg7: memref<1x128xf32, #tpu.memory_space<vmem>>, %arg8: memref<128x128xf32, #tpu.memory_space<vmem>>) attributes {dimension_semantics = [#tpu.dimension_semantics<parallel>, #tpu.dimension_semantics<parallel>], iteration_bounds = array<i64: 1, 1>, scalar_prefetch = 0 : i64, scratch_operands = 0 : i64, tpu.core_type = #tpu.core_type<tc>, window_params = [{transform_indices = @transform_0, window_bounds = array<i64: 128, 72>}, {transform_indices = @transform_1, window_bounds = array<i64: 72, 128>}, {transform_indices = @transform_2, window_bounds = array<i64: 1, 128>}, {transform_indices = @transform_3, window_bounds = array<i64: 128, 4>}, {transform_indices = @transform_4, window_bounds = array<i64: 4, 128>}, {transform_indices = @transform_5, window_bounds = array<i64: 1, 128>}, {transform_indices = @transform_6, window_bounds = array<i64: 128, 128>}]} {
    %c0 = arith.constant 0 : index
    %c0_0 = arith.constant 0 : index
    %0 = vector.load %arg2[%c0, %c0_0] : memref<128x72xbf16, #tpu.memory_space<vmem>>, vector<128x72xbf16>
    %c0_1 = arith.constant 0 : index
    %c0_2 = arith.constant 0 : index
    %1 = vector.load %arg3[%c0_1, %c0_2] : memref<72x128xbf16, #tpu.memory_space<vmem>>, vector<72x128xbf16>
    %cst = arith.constant dense<0.000000e+00> : vector<128x128xf32>
    %2 = tpu.matmul %0, %1, %cst {dimension_numbers = #tpu.dot_dimension_numbers<[1], [0], [0], [1], [0, 0, 1, 1], [], []>} : vector<128x72xbf16>, vector<72x128xbf16>, vector<128x128xf32> -> vector<128x128xf32>
    %c0_3 = arith.constant 0 : index
    %c0_4 = arith.constant 0 : index
    %3 = vector.load %arg5[%c0_3, %c0_4] : memref<128x4xbf16, #tpu.memory_space<vmem>>, vector<128x4xbf16>
    %c0_5 = arith.constant 0 : index
    %c0_6 = arith.constant 0 : index
    %4 = vector.load %arg6[%c0_5, %c0_6] : memref<4x128xbf16, #tpu.memory_space<vmem>>, vector<4x128xbf16>
    %cst_7 = arith.constant dense<0.000000e+00> : vector<128x128xf32>
    %5 = tpu.matmul %3, %4, %cst_7 {dimension_numbers = #tpu.dot_dimension_numbers<[1], [0], [0], [1], [0, 0, 1, 1], [], []>} : vector<128x4xbf16>, vector<4x128xbf16>, vector<128x128xf32> -> vector<128x128xf32>
    %c0_8 = arith.constant 0 : index
    %c0_9 = arith.constant 0 : index
    %6 = vector.load %arg7[%c0_8, %c0_9] : memref<1x128xf32, #tpu.memory_space<vmem>>, vector<1x128xf32>
    %7 = vector.broadcast %6 : vector<1x128xf32> to vector<128x128xf32>
    %8 = arith.addf %5, %7 : vector<128x128xf32>
    %c0_10 = arith.constant 0 : index
    %c0_11 = arith.constant 0 : index
    %9 = vector.load %arg4[%c0_10, %c0_11] : memref<1x128xf32, #tpu.memory_space<vmem>>, vector<1x128xf32>
    %10 = vector.broadcast %9 : vector<1x128xf32> to vector<128x128xf32>
    %11 = arith.addf %2, %10 : vector<128x128xf32>
    %cst_12 = arith.constant 0.000000e+00 : f32
    %12 = vector.broadcast %cst_12 : f32 to vector<128x128xf32>
    %13 = arith.maximumf %11, %12 : vector<128x128xf32>
    %14 = arith.addf %13, %8 : vector<128x128xf32>
    %cst_13 = arith.constant 0.000000e+00 : f32
    %15 = vector.broadcast %cst_13 : f32 to vector<128x128xf32>
    %16 = arith.maximumf %14, %15 : vector<128x128xf32>
    %c0_14 = arith.constant 0 : index
    %c0_15 = arith.constant 0 : index
    %17 = vector.load %arg8[%c0_14, %c0_15] : memref<128x128xf32, #tpu.memory_space<vmem>>, vector<128x128xf32>
    tpu.vector_store %arg8[%c0_14, %c0_15], %16 {strides = array<i32>} : memref<128x128xf32, #tpu.memory_space<vmem>>, vector<128x128xf32>,
    return
  }
  func.func @transform_0(%arg0: i32, %arg1: i32) -> (i32, i32) {
    %c0_i32 = arith.constant 0 : i32
    %c0_i32_0 = arith.constant 0 : i32
    return %arg0, %c0_i32 : i32, i32
  }
  func.func @transform_1(%arg0: i32, %arg1: i32) -> (i32, i32) {
    %c0_i32 = arith.constant 0 : i32
    %c0_i32_0 = arith.constant 0 : i32
    return %c0_i32, %arg1 : i32, i32
  }
  func.func @transform_2(%arg0: i32, %arg1: i32) -> (i32, i32) {
    %c0_i32 = arith.constant 0 : i32
    %c0_i32_0 = arith.constant 0 : i32
    return %c0_i32, %arg1 : i32, i32
  }
  func.func @transform_3(%arg0: i32, %arg1: i32) -> (i32, i32) {
    %c0_i32 = arith.constant 0 : i32
    %c0_i32_0 = arith.constant 0 : i32
    return %arg0, %c0_i32 : i32, i32
  }
  func.func @transform_4(%arg0: i32, %arg1: i32) -> (i32, i32) {
    %c0_i32 = arith.constant 0 : i32
    %c0_i32_0 = arith.constant 0 : i32
    return %c0_i32, %arg1 : i32, i32
  }
  func.func @transform_5(%arg0: i32, %arg1: i32) -> (i32, i32) {
    %c0_i32 = arith.constant 0 : i32
    %c0_i32_0 = arith.constant 0 : i32
    return %c0_i32, %arg1 : i32, i32
  }
  func.func @transform_6(%arg0: i32, %arg1: i32) -> (i32, i32) {
    %c0_i32 = arith.constant 0 : i32
    return %arg0, %arg1 : i32, i32
  }
}

</mosaic_0001>

<bundles_post_ra>
// kernel: resblock_forward.2
= control target key start
LH: loop header
LB: loop body
LE: loop exit
PB: predicated region body
PF: predicated region fallthrough
CT: control target
= control target key end

     0   :  { %vm98_vm0 = vcmask 293888   ;;  %vm123_vm1 = vcmask 1041408   ;;  %s563_s1 = inlined_call_operand.vmem [shape: bf16[36,128], index: 1, kind: input, shape index: {}]   ;;  %s564_s0 = inlined_call_operand.vmem [shape: bf16[128,36], index: 0, kind: input, shape index: {}]   ;;  %s565_s2 = inlined_call_operand.vmem [shape: f32[1,128], index: 2, kind: input, shape index: {}]   ;;  %s566_s3 = inlined_call_operand.vmem [shape: bf16[128,128], index: 3, kind: output, shape index: {}]  }
   0x1   :  { %v464_v0 = vld [vmem:[%s563_s1] sm:$0xff]   ;;  %v465_v1 = vld [vmem:[%s563_s1 + $0x8] sm:$0xff]   ;;  %v466_v2 = vld [vmem:[%s563_s1 + $0x10] ss:$0 sps:$4 sm:$0x33]  }
   0x2   :  { %434 = vmatprep.subr.bf16.mxu0 %v464_v0  ;;  %456 = vmatprep.subr.bf16.mxu1 %v464_v0  ;;  %v467_v3 = vld [vmem:[%s564_s0] sm:$0xff]   ;;  %v125_v5 = vsel %vm123_vm1, %v466_v2, 0  ;;  %v469_v6 = vld [vmem:[%s564_s0 + $0x8] sm:$0xff]   ;;  %v471_v8 = vld [vmem:[%s564_s0 + $0x10] sm:$0xff]  }
   0x3   :  { %435 = vmatpush3.bf16.msra.mxu0 %v464_v0  ;;  %459 = vmatpush3.bf16.msra.mxu1 %v464_v0  ;;  %v468_v4 = vld [vmem:[%s564_s0 + $0x20] sm:$0xff]   ;;  %v470_v7 = vld [vmem:[%s564_s0 + $0x28] sm:$0xff]   ;;  %v472_v9 = vld [vmem:[%s564_s0 + $0x30] sm:$0xff]  }
   0x4   :  { %436 = vmatprep.subr.bf16.mxu0 %v465_v1  ;;  %457 = vmatprep.subr.bf16.mxu1 %v465_v1  ;;  %v473_v10 = vld [vmem:[%s564_s0 + $0x18] sm:$0xff]   ;;  %v324_v12 = vld [vmem:[%s565_s2] ss:$0 sm:$0xff] }
   0x5   :  { %440 = vmatprep.mubr.msk.bf16.mxu0 %vm98_vm0, %v467_v3  ;;  %448 = vmatprep.mubr.msk.bf16.mxu1 %vm98_vm0, %v468_v4  ;;  %v474_v11 = vld [vmem:[%s564_s0 + $0x38] sm:$0xff]  }
   0x7   :  { %437 = vmatpush3.bf16.msra.mxu0 %v465_v1  ;;  %460 = vmatpush3.bf16.msra.mxu1 %v465_v1 }
   0x8   :  { %462 = vmatprep.subr.msk.bf16.mxu0 %vm123_vm1, %v466_v2  ;;  %463 = vmatprep.subr.msk.bf16.mxu1 %vm123_vm1, %v466_v2 }
   0xb   :  { %439 = vmatpush3.bf16.msra.mxu0 %v125_v5  ;;  %461 = vmatpush3.bf16.msra.mxu1 %v125_v5 }
   0xe   :  { %441 = vmatmul.mubr.msk.bf16.vlgmr.msra.gmra.mrb[0].mxu0 %vm98_vm0, %v469_v6  ;;  %449 = vmatmul.mubr.msk.bf16.vlgmr.msra.gmra.mrb[0].mxu1 %vm98_vm0, %v470_v7 }
   0xf   :  { %444 = vmatprep.mubr.msk.bf16.mxu0 %vm98_vm0, %v471_v8  ;;  %452 = vmatprep.mubr.msk.bf16.mxu1 %vm98_vm0, %v472_v9 }
  0x16   :  { %445 = vmatmul.mubr.msk.bf16.gmra.mrb[4].mxu0 %vm98_vm0, %v473_v10  ;;  %453 = vmatmul.mubr.msk.bf16.gmra.mrb[4].mxu1 %vm98_vm0, %v474_v11 }
  0xe1   :  { %v442_v13 = vpop.f32.mrb[0].mxu0  ;;  %v450_v14 = vpop.f32.mrb[0].mxu1 }
  0xe2   :  { %v170_v15 = vadd.f32 %v442_v13, %v324_v12  ;;  %v202_v16 = vadd.f32 %v450_v14, %v324_v12  ;;  %v161_v17 = vpop.f32.mrb[1].mxu0  ;;  %v193_v18 = vpop.f32.mrb[1].mxu1 }
  0xe3   :  { %v162_v19 = vadd.f32 %v324_v12, %v161_v17  ;;  %v194_v20 = vadd.f32 %v324_v12, %v193_v18  ;;  %v443_v21 = vpop.f32.mrb[2].mxu0  ;;  %v451_v22 = vpop.f32.mrb[2].mxu1 }
  0xe4   :  { %v173_v23 = vadd.f32 %v443_v21, %v324_v12  ;;  %v205_v24 = vadd.f32 %v451_v22, %v324_v12  ;;  %v164_v25 = vpop.f32.mrb[3].mxu0  ;;  %v196_v26 = vpop.f32.mrb[3].mxu1  ;;  %v226_v29 = vmax.f32 %v170_v15, 0.0  ;;  %v234_v30 = vmax.f32 %v202_v16, 0.0 }
  0xe5   :  { %v165_v27 = vadd.f32 %v324_v12, %v164_v25  ;;  %v197_v28 = vadd.f32 %v324_v12, %v196_v26  ;;  %v224_v33 = vmax.f32 %v162_v19, 0.0  ;;  %v232_v34 = vmax.f32 %v194_v20, 0.0 }
  0xe6   :  { %v227_v31 = vmax.f32 %v173_v23, 0.0  ;;  %v235_v32 = vmax.f32 %v205_v24, 0.0 }
  0xe7   :  { %v225_v35 = vmax.f32 %v165_v27, 0.0  ;;  %v233_v36 = vmax.f32 %v197_v28, 0.0 }
  0xe8   :  { %v384_v37 = vpack.c.bf16 %v227_v31, %v226_v29  ;;  %v404_v38 = vpack.c.bf16 %v235_v32, %v234_v30 }
  0xe9   :  { %v379_v39 = vpack.c.bf16 %v225_v35, %v224_v33  ;;  %v399_v40 = vpack.c.bf16 %v233_v36, %v232_v34  ;;  %v446_v41 = vpop.f32.mrb[4].mxu0  ;;  %v454_v42 = vpop.f32.mrb[4].mxu1 }
  0xea   :  { %416 = vst [vmem:[%s566_s3 + $0x8] sm:$0xff] %v384_v37   ;;  %420 = vst [vmem:[%s566_s3 + $0x28] sm:$0xff] %v404_v38   ;;  %v186_v43 = vadd.f32 %v446_v41, %v324_v12  ;;  %v218_v44 = vadd.f32 %v454_v42, %v324_v12  ;;  %v177_v45 = vpop.f32.mrb[5].mxu0  ;;  %v209_v46 = vpop.f32.mrb[5].mxu1 }
  0xeb   :  { %380 = vst [vmem:[%s566_s3] sm:$0xff] %v379_v39   ;;  %419 = vst [vmem:[%s566_s3 + $0x20] sm:$0xff] %v399_v40   ;;  %v178_v47 = vadd.f32 %v324_v12, %v177_v45  ;;  %v210_v48 = vadd.f32 %v324_v12, %v209_v46  ;;  %v447_v49 = vpop.f32.mrb[6].mxu0  ;;  %v455_v50 = vpop.f32.mrb[6].mxu1 }
  0xec   :  { %v189_v51 = vadd.f32 %v447_v49, %v324_v12  ;;  %v221_v52 = vadd.f32 %v455_v50, %v324_v12  ;;  %v180_v53 = vpop.f32.mrb[7].mxu0  ;;  %v212_v54 = vpop.f32.mrb[7].mxu1  ;;  %v230_v57 = vmax.f32 %v186_v43, 0.0  ;;  %v238_v58 = vmax.f32 %v218_v44, 0.0 }
  0xed   :  { %v181_v55 = vadd.f32 %v324_v12, %v180_v53  ;;  %v213_v56 = vadd.f32 %v324_v12, %v212_v54  ;;  %v228_v61 = vmax.f32 %v178_v47, 0.0  ;;  %v236_v62 = vmax.f32 %v210_v48, 0.0 }
  0xee   :  { %v231_v59 = vmax.f32 %v189_v51, 0.0  ;;  %v239_v60 = vmax.f32 %v221_v52, 0.0 }
  0xef   :  { %v229_v63 = vmax.f32 %v181_v55, 0.0  ;;  %v237_v0 = vmax.f32 %v213_v56, 0.0 }
  0xf0   :  { %v394_v1 = vpack.c.bf16 %v231_v59, %v230_v57  ;;  %v414_v2 = vpack.c.bf16 %v239_v60, %v238_v58 }
  0xf1   :  { %v389_v3 = vpack.c.bf16 %v229_v63, %v228_v61  ;;  %v409_v4 = vpack.c.bf16 %v237_v0, %v236_v62 }
  0xf2   :  { %418 = vst [vmem:[%s566_s3 + $0x18] sm:$0xff] %v394_v1   ;;  %422 = vst [vmem:[%s566_s3 + $0x38] sm:$0xff] %v414_v2  }
  0xf3   :  { %417 = vst [vmem:[%s566_s3 + $0x10] sm:$0xff] %v389_v3   ;;  %421 = vst [vmem:[%s566_s3 + $0x30] sm:$0xff] %v409_v4  }

// kernel: resblock_forward.3
= control target key start
LH: loop header
LB: loop body
LE: loop exit
PB: predicated region body
PF: predicated region fallthrough
CT: control target
= control target key end

     0   :  { %vm138_vm0 = vcmask 1041408   ;;  %vm113_vm1 = vcmask 31744   ;;  %vm313_vm2 = vcmask 588800   ;;  %vm338_vm3 = vcmask 1043456   ;;  %s835_s4 = inlined_call_operand.vmem [shape: bf16[4,128], index: 4, kind: input, shape index: {}]   ;;  %s836_s1 = inlined_call_operand.vmem [shape: bf16[72,128], index: 1, kind: input, shape index: {}]   ;;  %s837_s3 = inlined_call_operand.vmem [shape: bf16[128,4], index: 3, kind: input, shape index: {}]   ;;  %s838_s0 = inlined_call_operand.vmem [shape: bf16[128,72], index: 0, kind: input, shape index: {}]   ;;  %s839_s2 = inlined_call_operand.vmem [shape: f32[1,128], index: 2, kind: input, shape index: {}]   ;;  %s840_s5 = inlined_call_operand.vmem [shape: f32[1,128], index: 5, kind: input, shape index: {}]   ;;  %s841_s6 = inlined_call_operand.vmem [shape: f32[128,128], index: 6, kind: output, shape index: {}]  }
   0x1   :  { %v65_v0 = vld [vmem:[%s835_s4] sm:$0x3]  ;;  %v627_v4 = vld [vmem:[%s837_s3 + $0x8] sm:$0xff]   ;;  %v629_v6 = vld [vmem:[%s836_s1 + $0x10] sm:$0xff]  }
   0x2   :  { %622 = vmatprep.subr.msk.bf16.mxu0 %vm138_vm0, %v65_v0  ;;  %v140_v1 = vsel %vm138_vm0, %v65_v0, 0  ;;  %v625_v2 = vld [vmem:[%s836_s1] sm:$0xff]   ;;  %v628_v5 = vld [vmem:[%s836_s1 + $0x8] sm:$0xff]   ;;  %v630_v7 = vld [vmem:[%s837_s3 + $0x10] sm:$0xff]  }
   0x3   :  { %569 = vmatpush3.bf16.msra.mxu0 %v140_v1  ;;  %v626_v3 = vld [vmem:[%s837_s3] sm:$0xff]   ;;  %612 = vmatprep.subr.bf16.mxu1 %v625_v2  ;;  %v631_v8 = vld [vmem:[%s837_s3 + $0x18] sm:$0xff]   ;;  %v636_v11 = vld [vmem:[%s838_s0 + $0x10] sm:$0xff]  }
   0x4   :  { %586 = vmatprep.subr.bf16.mxu0 %v625_v2  ;;  %570 = vmatprep.mubr.msk.bf16.mxu0 %vm113_vm1, %v626_v3  ;;  %v632_v9 = vld [vmem:[%s836_s1 + $0x18] sm:$0xff]   ;;  %v634_v10 = vld [vmem:[%s837_s3 + $0x20] sm:$0xff]   ;;  %v635_v14 = vld [vmem:[%s837_s3 + $0x28] sm:$0xff]  }
   0x5   :  { %617 = vmatpush3.bf16.msra.mxu1 %v625_v2  ;;  %v633_v12 = vld [vmem:[%s836_s1 + $0x20] ss:$0 sps:$4 sm:$0xff]   ;;  %600 = vmatprep.mubr.msk.bf16.mxu1 %vm313_vm2, %v636_v11  ;;  %v638_v15 = vld [vmem:[%s837_s3 + $0x30] sm:$0xff]   ;;  %v637_v16 = vld [vmem:[%s838_s0 + $0x18] sm:$0xff]  }
   0x6   :  { %571 = vmatmul.mubr.msk.bf16.vlgmr.msra.gmra.mrb[0].mxu0 %vm113_vm1, %v627_v4  ;;  %613 = vmatprep.subr.bf16.mxu1 %v628_v5  ;;  %v340_v13 = vsel %vm338_vm3, %v633_v12, 0  ;;  %v640_v17 = vld [vmem:[%s838_s0 + $0x20] sm:$0xff]   ;;  %v639_v18 = vld [vmem:[%s837_s3 + $0x38] sm:$0xff]   ;;  %v641_v20 = vld [vmem:[%s838_s0 + $0x28] sm:$0xff]  }
   0x7   :  { %587 = vmatpush3.bf16.msra.mxu0 %v625_v2  ;;  %574 = vmatprep.mubr.msk.bf16.mxu0 %vm113_vm1, %v630_v7  ;;  %v642_v19 = vld [vmem:[%s838_s0] sm:$0xff]   ;;  %v644_v21 = vld [vmem:[%s838_s0 + $0x30] sm:$0xff]   ;;  %v643_v22 = vld [vmem:[%s838_s0 + $0x8] sm:$0xff]  }
   0x8   :  { %588 = vmatprep.subr.bf16.mxu0 %v628_v5  ;;  %v645_v23 = vld [vmem:[%s838_s0 + $0x38] sm:$0xff]   ;;  %v766_v33 = vld [vmem:[%s839_s2] ss:$0 sm:$0xff] }
   0x9   :  { %618 = vmatpush3.bf16.msra.mxu1 %v628_v5  ;;  %v507_v40 = vld [vmem:[%s840_s5] ss:$0 sm:$0xff] }
   0xa   :  { %614 = vmatprep.subr.bf16.mxu1 %v629_v6 }
   0xb   :  { %589 = vmatpush3.bf16.msra.mxu0 %v628_v5 }
   0xc   :  { %590 = vmatprep.subr.bf16.mxu0 %v629_v6 }
   0xd   :  { %619 = vmatpush3.bf16.msra.mxu1 %v629_v6 }
   0xe   :  { %575 = vmatmul.mubr.msk.bf16.gmra.mrb[4].mxu0 %vm113_vm1, %v631_v8  ;;  %615 = vmatprep.subr.bf16.mxu1 %v632_v9 }
   0xf   :  { %578 = vmatprep.mubr.msk.bf16.mxu0 %vm113_vm1, %v634_v10  ;;  %591 = vmatpush3.bf16.msra.mxu0 %v629_v6 }
  0x10   :  { %592 = vmatprep.subr.bf16.mxu0 %v632_v9 }
  0x11   :  { %620 = vmatpush3.bf16.msra.mxu1 %v632_v9 }
  0x12   :  { %624 = vmatprep.subr.msk.bf16.mxu1 %vm338_vm3, %v633_v12 }
  0x13   :  { %593 = vmatpush3.bf16.msra.mxu0 %v632_v9 }
  0x14   :  { %623 = vmatprep.subr.msk.bf16.mxu0 %vm338_vm3, %v633_v12 }
  0x15   :  { %621 = vmatpush3.bf16.msra.mxu1 %v340_v13 }
  0x16   :  { %579 = vmatmul.mubr.msk.bf16.gmra.mrb[8].mxu0 %vm113_vm1, %v635_v14 }
  0x17   :  { %582 = vmatprep.mubr.msk.bf16.mxu0 %vm113_vm1, %v638_v15  ;;  %595 = vmatpush3.bf16.msra.mxu0 %v340_v13 }
  0x18   :  { %601 = vmatmul.mubr.msk.bf16.vlgmr.msra.gmra.mrb[0].mxu1 %vm313_vm2, %v637_v16 }
  0x19   :  { %604 = vmatprep.mubr.msk.bf16.mxu1 %vm313_vm2, %v640_v17 }
  0x1e   :  { %583 = vmatmul.mubr.msk.bf16.gmra.mrb[12].mxu0 %vm113_vm1, %v639_v18 }
  0x1f   :  { %596 = vmatprep.mubr.msk.bf16.mxu0 %vm313_vm2, %v642_v19 }
  0x20   :  { %605 = vmatmul.mubr.msk.bf16.gmra.mrb[4].mxu1 %vm313_vm2, %v641_v20 }
  0x21   :  { %608 = vmatprep.mubr.msk.bf16.mxu1 %vm313_vm2, %v644_v21 }
  0x26   :  { %597 = vmatmul.mubr.msk.bf16.vlgmr.msra.gmra.mrb[16].mxu0 %vm313_vm2, %v643_v22 }
  0x28   :  { %609 = vmatmul.mubr.msk.bf16.gmra.mrb[8].mxu1 %vm313_vm2, %v645_v23 }
  0xd9   :  { %v572_v24 = vpop.f32.mrb[0].mxu0 }
  0xda   :  { %v176_v25 = vpop.f32.mrb[1].mxu0  ;;  %v185_v4 = vadd.f32 %v572_v24, %v507_v40 }
  0xdb   :  { %v573_v26 = vpop.f32.mrb[2].mxu0  ;;  %v177_v5 = vadd.f32 %v507_v40, %v176_v25 }
  0xdc   :  { %v179_v27 = vpop.f32.mrb[3].mxu0  ;;  %v188_v9 = vadd.f32 %v573_v26, %v507_v40 }
  0xdd   :  { %v180_v14 = vadd.f32 %v507_v40, %v179_v27 }
  0xe1   :  { %v576_v28 = vpop.f32.mrb[4].mxu0 }
  0xe2   :  { %v192_v29 = vpop.f32.mrb[5].mxu0  ;;  %v201_v43 = vadd.f32 %v576_v28, %v507_v40 }
  0xe3   :  { %v577_v30 = vpop.f32.mrb[6].mxu0  ;;  %v193_v47 = vadd.f32 %v507_v40, %v192_v29 }
  0xe4   :  { %v195_v31 = vpop.f32.mrb[7].mxu0  ;;  %v204_v50 = vadd.f32 %v577_v30, %v507_v40 }
  0xe5   :  { %v196_v53 = vadd.f32 %v507_v40, %v195_v31 }
  0xe9   :  { %v580_v32 = vpop.f32.mrb[8].mxu0 }
  0xea   :  { %v208_v34 = vpop.f32.mrb[9].mxu0  ;;  %v217_v10 = vadd.f32 %v580_v32, %v507_v40 }
  0xeb   :  { %v581_v35 = vpop.f32.mrb[10].mxu0  ;;  %v602_v36 = vpop.f32.mrb[0].mxu1  ;;  %v209_v15 = vadd.f32 %v507_v40, %v208_v34 }
  0xec   :  { %v401_v37 = vadd.f32 %v602_v36, %v766_v33  ;;  %v211_v38 = vpop.f32.mrb[11].mxu0  ;;  %v392_v39 = vpop.f32.mrb[1].mxu1  ;;  %v220_v18 = vadd.f32 %v581_v35, %v507_v40 }
  0xed   :  { %v393_v41 = vadd.f32 %v766_v33, %v392_v39  ;;  %v603_v42 = vpop.f32.mrb[2].mxu1  ;;  %v212_v19 = vadd.f32 %v507_v40, %v211_v38 }
  0xee   :  { %v445_v44 = vmax.f32 %v401_v37, 0.0  ;;  %v404_v45 = vadd.f32 %v603_v42, %v766_v33  ;;  %v395_v46 = vpop.f32.mrb[3].mxu1 }
  0xef   :  { %v443_v48 = vmax.f32 %v393_v41, 0.0  ;;  %v396_v49 = vadd.f32 %v766_v33, %v395_v46 }
  0xf0   :  { %v461_v51 = vadd.f32 %v445_v44, %v201_v43  ;;  %v446_v52 = vmax.f32 %v404_v45, 0.0 }
  0xf1   :  { %v459_v54 = vadd.f32 %v443_v48, %v193_v47  ;;  %v444_v55 = vmax.f32 %v396_v49, 0.0  ;;  %v584_v56 = vpop.f32.mrb[12].mxu0 }
  0xf2   :  { %v477_v57 = vmax.f32 %v461_v51, 0.0  ;;  %v462_v58 = vadd.f32 %v446_v52, %v204_v50  ;;  %v224_v59 = vpop.f32.mrb[13].mxu0  ;;  %v233_v22 = vadd.f32 %v584_v56, %v507_v40 }
  0xf3   :  { %v475_v60 = vmax.f32 %v459_v54, 0.0  ;;  %v460_v61 = vadd.f32 %v444_v55, %v196_v53  ;;  %v585_v62 = vpop.f32.mrb[14].mxu0  ;;  %v606_v63 = vpop.f32.mrb[4].mxu1  ;;  %v225_v23 = vadd.f32 %v507_v40, %v224_v59 }
  0xf4   :  { %493 = vst [vmem:[%s841_s6 + $0x30] sm:$0xff] %v477_v57  ;;  %v478_v0 = vmax.f32 %v462_v58, 0.0  ;;  %v417_v1 = vadd.f32 %v606_v63, %v766_v33  ;;  %v227_v2 = vpop.f32.mrb[15].mxu0  ;;  %v408_v3 = vpop.f32.mrb[5].mxu1  ;;  %v236_v28 = vadd.f32 %v585_v62, %v507_v40 }
  0xf5   :  { %491 = vst [vmem:[%s841_s6 + $0x20] sm:$0xff] %v475_v60  ;;  %v476_v6 = vmax.f32 %v460_v61, 0.0  ;;  %v409_v7 = vadd.f32 %v766_v33, %v408_v3  ;;  %v607_v8 = vpop.f32.mrb[6].mxu1  ;;  %v228_v32 = vadd.f32 %v507_v40, %v227_v2 }
  0xf6   :  { %494 = vst [vmem:[%s841_s6 + $0x38] sm:$0xff] %v478_v0  ;;  %v449_v11 = vmax.f32 %v417_v1, 0.0  ;;  %v420_v12 = vadd.f32 %v607_v8, %v766_v33  ;;  %v411_v13 = vpop.f32.mrb[7].mxu1 }
  0xf7   :  { %492 = vst [vmem:[%s841_s6 + $0x28] sm:$0xff] %v476_v6  ;;  %v447_v16 = vmax.f32 %v409_v7, 0.0  ;;  %v412_v17 = vadd.f32 %v766_v33, %v411_v13 }
  0xf8   :  { %v465_v20 = vadd.f32 %v449_v11, %v217_v10  ;;  %v450_v21 = vmax.f32 %v420_v12, 0.0 }
  0xf9   :  { %v463_v24 = vadd.f32 %v447_v16, %v209_v15  ;;  %v448_v25 = vmax.f32 %v412_v17, 0.0  ;;  %v598_v26 = vpop.f32.mrb[16].mxu0 }
  0xfa   :  { %v481_v29 = vmax.f32 %v465_v20, 0.0  ;;  %v466_v27 = vadd.f32 %v450_v21, %v220_v18  ;;  %v385_v30 = vadd.f32 %v598_v26, %v766_v33  ;;  %v376_v31 = vpop.f32.mrb[17].mxu0 }
  0xfb   :  { %v479_v34 = vmax.f32 %v463_v24, 0.0  ;;  %v464_v36 = vadd.f32 %v448_v25, %v212_v19  ;;  %v377_v37 = vadd.f32 %v766_v33, %v376_v31  ;;  %v599_v35 = vpop.f32.mrb[18].mxu0  ;;  %v610_v38 = vpop.f32.mrb[8].mxu1 }
  0xfc   :  { %497 = vst [vmem:[%s841_s6 + $0x50] sm:$0xff] %v481_v29  ;;  %v482_v39 = vmax.f32 %v466_v27, 0.0  ;;  %v441_v41 = vmax.f32 %v385_v30, 0.0  ;;  %v388_v42 = vadd.f32 %v599_v35, %v766_v33  ;;  %v433_v43 = vadd.f32 %v610_v38, %v766_v33  ;;  %v379_v44 = vpop.f32.mrb[19].mxu0  ;;  %v424_v45 = vpop.f32.mrb[9].mxu1 }
  0xfd   :  { %495 = vst [vmem:[%s841_s6 + $0x40] sm:$0xff] %v479_v34  ;;  %v480_v40 = vmax.f32 %v464_v36, 0.0  ;;  %v439_v46 = vmax.f32 %v377_v37, 0.0  ;;  %v380_v47 = vadd.f32 %v766_v33, %v379_v44  ;;  %v425_v48 = vadd.f32 %v766_v33, %v424_v45  ;;  %v611_v49 = vpop.f32.mrb[10].mxu1 }
  0xfe   :  { %498 = vst [vmem:[%s841_s6 + $0x58] sm:$0xff] %v482_v39  ;;  %v457_v50 = vadd.f32 %v441_v41, %v185_v4  ;;  %v442_v51 = vmax.f32 %v388_v42, 0.0  ;;  %v453_v52 = vmax.f32 %v433_v43, 0.0  ;;  %v436_v53 = vadd.f32 %v611_v49, %v766_v33  ;;  %v427_v54 = vpop.f32.mrb[11].mxu1 }
  0xff   :  { %496 = vst [vmem:[%s841_s6 + $0x48] sm:$0xff] %v480_v40  ;;  %v455_v55 = vadd.f32 %v439_v46, %v177_v5  ;;  %v440_v56 = vmax.f32 %v380_v47, 0.0  ;;  %v451_v57 = vmax.f32 %v425_v48, 0.0  ;;  %v428_v58 = vadd.f32 %v766_v33, %v427_v54 }
 0x100   :  { %v473_v59 = vmax.f32 %v457_v50, 0.0  ;;  %v458_v60 = vadd.f32 %v442_v51, %v188_v9  ;;  %v469_v61 = vadd.f32 %v453_v52, %v233_v22  ;;  %v454_v62 = vmax.f32 %v436_v53, 0.0 }
 0x101   :  { %v471_v63 = vmax.f32 %v455_v55, 0.0  ;;  %v456_v0 = vadd.f32 %v440_v56, %v180_v14  ;;  %v467_v1 = vadd.f32 %v451_v57, %v225_v23  ;;  %v452_v2 = vmax.f32 %v428_v58, 0.0 }
 0x102   :  { %489 = vst [vmem:[%s841_s6 + $0x10] sm:$0xff] %v473_v59  ;;  %v474_v3 = vmax.f32 %v458_v60, 0.0  ;;  %v485_v4 = vmax.f32 %v469_v61, 0.0  ;;  %v470_v6 = vadd.f32 %v454_v62, %v236_v28 }
 0x103   :  { %487 = vst [vmem:[%s841_s6] sm:$0xff] %v471_v63  ;;  %v472_v33 = vmax.f32 %v456_v0, 0.0  ;;  %v483_v5 = vmax.f32 %v467_v1, 0.0  ;;  %v468_v7 = vadd.f32 %v452_v2, %v228_v32 }
 0x104   :  { %490 = vst [vmem:[%s841_s6 + $0x18] sm:$0xff] %v474_v3  ;;  %501 = vst [vmem:[%s841_s6 + $0x70] sm:$0xff] %v485_v4  ;;  %v486_v8 = vmax.f32 %v470_v6, 0.0 }
 0x105   :  { %488 = vst [vmem:[%s841_s6 + $0x8] sm:$0xff] %v472_v33  ;;  %499 = vst [vmem:[%s841_s6 + $0x60] sm:$0xff] %v483_v5  ;;  %v484_v9 = vmax.f32 %v468_v7, 0.0 }
 0x106   :  { %502 = vst [vmem:[%s841_s6 + $0x78] sm:$0xff] %v486_v8 }
 0x107   :  { %500 = vst [vmem:[%s841_s6 + $0x68] sm:$0xff] %v484_v9 }

</bundles_post_ra>
